<compile_context>
chip_gen: v7x
topology: tpu7x:2x2x1
jax: 0.10.0
libtpu: 0.0.40
codegen_flags: <defaults>
</compile_context>

<pallas_src>
import functools

import jax
import jax.numpy as jnp
from jax.experimental import pallas as pl
from jax.experimental.pallas import tpu as pltpu


def _round_up(x, m):
    return ((x + m - 1) // m) * m


def _cdiv(a, b):
    return -(-a // b)


# --------------------------------------------------------------------------
# Kernels
# --------------------------------------------------------------------------
def _gap_kernel_fast(x_ref, o_ref, *, inv_hw):
    """H*W fits in one block: single f32 lane-reduction straight to the output."""
    s = jnp.sum(x_ref[...], axis=-1, dtype=jnp.float32, keepdims=True)
    o_ref[...] = (s * inv_hw).astype(o_ref.dtype)


def _gap_kernel_split(x_ref, o_ref, acc_ref, *, inv_hw, hw, tile_hw):
    """H*W split across grid axis 1 (last, "arbitrary").

    Accumulate into a lane-dense (tile_r, 128) f32 scratch using VALU adds only;
    the cross-lane (XLU) reduce + scale happen once, at the final k step. The
    ragged hw tail of the boundary block is masked (undefined data otherwise).
    """
    k = pl.program_id(1)

    @pl.when(k == 0)
    def _():
        acc_ref[...] = jnp.zeros_like(acc_ref)

    lanes = jax.lax.broadcasted_iota(jnp.int32, acc_ref.shape, dimension=1)
    base = k * tile_hw
    acc = acc_ref[...]
    for g in range(tile_hw // 128):  # static; tile_hw is a multiple of 128
        chunk = x_ref[:, g * 128:(g + 1) * 128].astype(jnp.float32)
        if hw % tile_hw != 0:
            # Only needed when hw has a ragged tail (boundary lanes undefined);
            # for interior blocks the predicate is all-true (cheap VPU select).
            chunk = jnp.where(base + g * 128 + lanes < hw, chunk, 0.0)
        acc = acc + chunk
    acc_ref[...] = acc

    @pl.when(k == pl.num_programs(1) - 1)
    def _():
        s = jnp.sum(acc_ref[...], axis=-1, keepdims=True)
        o_ref[...] = (s * inv_hw).astype(o_ref.dtype)


# --------------------------------------------------------------------------
# Tiling / wrapper
# --------------------------------------------------------------------------
def _choose_row_tile(rows, row_align, max_rows):
    if rows < row_align:
        return rows  # full-dim block is always a legal block shape
    tile_r = min(max_rows, rows)
    if rows >= 2 * row_align:
        # v7x has 2 TensorCores: keep >= 2 blocks on the "parallel" rows axis.
        tile_r = min(tile_r, _cdiv(rows, 2))
    return max(row_align, (tile_r // row_align) * row_align)


def global_average_pooling(x, *, per_buf_bytes=8 * 1024 * 1024):
    """x: (N, C, H, W) -> (N, C, 1, 1), matching nn.AdaptiveAvgPool2d((1, 1))."""
    N, C, H, W = x.shape
    rows, hw = N * C, H * W
    itemsize = jnp.dtype(x.dtype).itemsize
    row_align = 8 * max(1, 4 // itemsize)  # sublane alignment (packed dtypes)
    inv_hw = 1.0 / float(hw)

    x2d = x.reshape(rows, hw)
    out_bytes_per_row = 2 * 128 * itemsize  # lane-padded, double-buffered output
    headroom = 4 << 20

    rows_fit = per_buf_bytes // max(1, hw * itemsize)

    if rows_fit >= row_align:
        # ---- common path: whole spatial extent in one block, 1-D grid ----
        tile_r = _choose_row_tile(rows, row_align, min(rows_fit, 8192))
        grid = (pl.cdiv(rows, tile_r),)
        vmem_limit = int(2 * tile_r * _round_up(hw, 128) * itemsize
                         + tile_r * out_bytes_per_row + headroom)
        vmem_limit = max(vmem_limit, 16 << 20)

        out2d = pl.pallas_call(
            functools.partial(_gap_kernel_fast, inv_hw=inv_hw),
            out_shape=jax.ShapeDtypeStruct((rows, 1), x.dtype),
            grid_spec=pltpu.PrefetchScalarGridSpec(
                num_scalar_prefetch=0,
                grid=grid,
                in_specs=[pl.BlockSpec((tile_r, hw), lambda i: (i, 0))],
                out_specs=pl.BlockSpec((tile_r, 1), lambda i: (i, 0)),
            ),
            compiler_params=pltpu.CompilerParams(
                dimension_semantics=("parallel",),
                vmem_limit_bytes=vmem_limit,
            ),
            cost_estimate=pl.CostEstimate(
                flops=rows * hw, transcendentals=0,
                bytes_accessed=rows * hw * itemsize + rows * itemsize),
        )(x2d)
    else:
        # ---- very large H*W: split spatial axis over a trailing reduction axis ----
        tile_r = _choose_row_tile(rows, row_align, 512)
        hw_fit = per_buf_bytes // max(1, tile_r * itemsize)
        tile_hw = max(128, (min(hw_fit, 16384) // 128) * 128)
        grid = (pl.cdiv(rows, tile_r), pl.cdiv(hw, tile_hw))
        vmem_limit = int(2 * tile_r * tile_hw * itemsize
                         + tile_r * out_bytes_per_row
                         + tile_r * 128 * 4 + headroom)
        vmem_limit = max(vmem_limit, 16 << 20)

        out2d = pl.pallas_call(
            functools.partial(_gap_kernel_split, inv_hw=inv_hw, hw=hw,
                              tile_hw=tile_hw),
            out_shape=jax.ShapeDtypeStruct((rows, 1), x.dtype),
            grid_spec=pltpu.PrefetchScalarGridSpec(
                num_scalar_prefetch=0,
                grid=grid,
                in_specs=[pl.BlockSpec((tile_r, tile_hw), lambda i, k: (i, k))],
                out_specs=pl.BlockSpec((tile_r, 1), lambda i, k: (i, 0)),
                scratch_shapes=[pltpu.VMEM((tile_r, 128), jnp.float32)],
            ),
            compiler_params=pltpu.CompilerParams(
                dimension_semantics=("parallel", "arbitrary"),
                vmem_limit_bytes=vmem_limit,
            ),
            cost_estimate=pl.CostEstimate(
                flops=rows * hw, transcendentals=0,
                bytes_accessed=rows * hw * itemsize + rows * itemsize),
        )(x2d)

    return out2d.reshape(N, C, 1, 1)


# --------------------------------------------------------------------------
# Tests
# --------------------------------------------------------------------------
if __name__ == "__main__":
    # Primary test: small shape consistent with the module.
    x = jax.random.normal(jax.random.PRNGKey(0), (2, 4, 16, 16), dtype=jnp.float32)
    out = global_average_pooling(x)
    jax.block_until_ready(out)
    ref = jnp.mean(x, axis=(2, 3), keepdims=True)
    assert out.shape == (2, 4, 1, 1)
    assert jnp.allclose(out, ref, atol=1e-5, rtol=1e-5)

    # Ragged tails: rows (N*C) and H*W not aligned to 8 / 128, no wrapper pad.
    x2 = jax.random.normal(jax.random.PRNGKey(1), (2, 3, 7, 9), dtype=jnp.float32)
    out2 = global_average_pooling(x2)
    jax.block_until_ready(out2)
    ref2 = jnp.mean(x2, axis=(2, 3), keepdims=True)
    assert out2.shape == (2, 3, 1, 1)
    assert jnp.allclose(out2, ref2, atol=1e-5, rtol=1e-5)

    # Multi-block rows axis (exercises the >=2 "parallel" blocks / tile cap path).
    x3 = jax.random.normal(jax.random.PRNGKey(2), (4, 64, 14, 14), dtype=jnp.float32)
    out3 = global_average_pooling(x3)
    jax.block_until_ready(out3)
    ref3 = jnp.mean(x3, axis=(2, 3), keepdims=True)
    assert out3.shape == (4, 64, 1, 1)
    assert jnp.allclose(out3, ref3, atol=1e-5, rtol=1e-5)

    # Split-spatial path (forced with a tiny per-buffer budget) incl. ragged hw tail.
    x4 = jax.random.normal(jax.random.PRNGKey(3), (2, 4, 16, 15), dtype=jnp.float32)
    out4 = global_average_pooling(x4, per_buf_bytes=4096)
    jax.block_until_ready(out4)
    ref4 = jnp.mean(x4, axis=(2, 3), keepdims=True)
    assert out4.shape == (2, 4, 1, 1)
    assert jnp.allclose(out4, ref4, atol=1e-5, rtol=1e-5)

    print("KERNEL_OK")
</pallas_src>

<mosaic_0001>
module attributes {stable_mosaic.version = 11 : i64} {
  func.func @_gap_kernel_fast(%arg0: i32, %arg1: memref<8x256xf32, #tpu.memory_space<vmem>>, %arg2: memref<8x1xf32, #tpu.memory_space<vmem>>) attributes {dimension_semantics = [#tpu.dimension_semantics<parallel>], iteration_bounds = array<i64: 1>, scalar_prefetch = 0 : i64, scratch_operands = 0 : i64, tpu.core_type = #tpu.core_type<tc>, window_params = [{transform_indices = @transform_0, window_bounds = array<i64: 8, 256>}, {transform_indices = @transform_1, window_bounds = array<i64: 8, 1>}]} {
    %c0 = arith.constant 0 : index
    %c0_0 = arith.constant 0 : index
    %0 = vector.load %arg1[%c0, %c0_0] : memref<8x256xf32, #tpu.memory_space<vmem>>, vector<8x256xf32>
    %cst = arith.constant dense<0.000000e+00> : vector<8xf32>
    %1 = vector.multi_reduction <add>, %0, %cst [1] : vector<8x256xf32> to vector<8xf32>
    %2 = vector.shape_cast %1 : vector<8xf32> to vector<8x1xf32>
    %cst_1 = arith.constant 3.906250e-03 : f32
    %3 = vector.broadcast %cst_1 : f32 to vector<8x1xf32>
    %4 = arith.mulf %2, %3 : vector<8x1xf32>
    %c0_2 = arith.constant 0 : index
    %c0_3 = arith.constant 0 : index
    %5 = vector.load %arg2[%c0_2, %c0_3] : memref<8x1xf32, #tpu.memory_space<vmem>>, vector<8x1xf32>
    tpu.vector_store %arg2[%c0_2, %c0_3], %4 {strides = array<i32>} : memref<8x1xf32, #tpu.memory_space<vmem>>, vector<8x1xf32>,
    return
  }
  func.func @transform_0(%arg0: i32) -> (i32, i32) {
    %c0_i32 = arith.constant 0 : i32
    %c0_i32_0 = arith.constant 0 : i32
    return %arg0, %c0_i32 : i32, i32
  }
  func.func @transform_1(%arg0: i32) -> (i32, i32) {
    %c0_i32 = arith.constant 0 : i32
    %c0_i32_0 = arith.constant 0 : i32
    return %arg0, %c0_i32 : i32, i32
  }
}

</mosaic_0001>

<bundles_post_ra>
// kernel: tpu_custom_call.1
= control target key start
LH: loop header
LB: loop body
LE: loop exit
PB: predicated region body
PF: predicated region fallthrough
CT: control target
= control target key end

     0   :  { %6 = vsyncpa [#allocation3], 0  ;;  %s58_s6 = smov [#allocation2]   ;;  %s84_s0 = inlined_call_operand.hbm [shape: f32[8,256], index: 0, kind: input, shape index: {}]   ;;  %s85_s1 = inlined_call_operand.vmem [shape: f32[8,1], index: 1, kind: output, shape index: {}]  }
   0x1   :  { %s13_s7 = sshll.u32 %s58_s6, 4  ;;  %s34_s10 = scalar_lea.hbm %s84_s0, 256  ;;  %s14_s7 = int_to_ptr.vmem [resolvable:$true] %s13_s7 }
   0x2   :  { %p35_p0 = scmp.ne.s32.totalorder %s84_s0, %s34_s10  ;;  %p38_p1 = scmp.lt.u32.totalorder %s34_s10, %s84_s0 }
   0x4   :  { %p40_p2 = pnand %p38_p1, %p35_p0 }
   0x6   :  { %43 = shalt.err (!%p40_p2)
}
   0x7   :  { %s44_s15 = scalar_lea.vmem %s14_s7, 256  ;;  %p49_p4 = scmp.lt.s32.totalorder %s14_s7, %s14_s7 }
   0x8   :  { %p45_p3 = scmp.ne.s32.totalorder %s14_s7, %s44_s15  ;;  %p50_p5 = scmp.lt.s32.totalorder %s44_s15, %s44_s15 }
   0xa   :  { %p51_p6 = por %p50_p5, %p49_p4 }
   0xc   :  { %p52_p7 = pnand %p51_p6, %p45_p3 }
   0xe   :  { %55 = shalt.err (!%p52_p7)
}
   0xf   :  { %16 = dma.hbm_to_vmem [thread:$0]  %s84_s0, 256, %s14_s7, [#allocation3]  }
  0x10   :  { %56 = dma.done.wait [#allocation3], 256  }
  0x11   :  { %57 = vsyncadd [#allocation3], 4294967040  ;;  %v20_v0 = vld [vmem:[#allocation2] sm:$0xff]  ;;  %v21_v1 = vld [vmem:[#allocation2 + $0x8] sm:$0xff]  ;;  %vm26_vm0 = vcmask 7168  }
  0x12   :  { %v22_v2 = vadd.f32 %v21_v1, %v20_v0 }
  0x14   :  { %23 = vadd.xlane.f32.xlu0 %v22_v2 }
  0xa1   :  { %v24_v3 = vpop.xlane.xlu0 %23 }
  0xa2   :  { %v25_v4 = vmul.f32 0.00390625, %v24_v3 }
  0xa4   :  { %27 = vst.msk [vmem:[%s85_s1] sm:$0xff] %vm26_vm0, %v25_v4 }
  0xa5   :  { %32 = vsyncpa [#allocation3], 1 }

</bundles_post_ra>
